<compile_context>
chip_gen: v6e
topology: v6e:2x2x1
jax: 0.10.0
libtpu: 0.0.40
codegen_flags: <defaults>
</compile_context>

<pallas_src>
import functools

import jax
import jax.numpy as jnp
from jax.experimental import pallas as pl
from jax.experimental.pallas import tpu as pltpu


def _round_up(x, m):
    return (x + m - 1) // m * m


def _detect_vmem_limit_bytes():
    """~0.75 of physical VMEM; conservative 48 MiB fallback (fits v7x's 64 MiB)."""
    try:
        info = pltpu.get_tpu_info()
        cap = int(getattr(info, "vmem_capacity_bytes"))
        return int(cap * 0.75)
    except Exception:
        return 48 * 1024 * 1024


def _detect_mxu_align():
    """Pad N/K dims to the MXU tile: 256 on v6e/v7x, 128 otherwise."""
    try:
        kind = jax.devices()[0].device_kind.lower()
    except Exception:
        return 128
    if "v6" in kind or "v7" in kind:
        return 256
    return 128


_VMEM_LIMIT_BYTES = _detect_vmem_limit_bytes()
_MXU_ALIGN = _detect_mxu_align()


def _ffn_kernel(x_ref, w1_ref, b1_ref, w2_ref, b2_ref, o_ref, acc_ref):
    """One (row-tile, d_ff-chunk) step of y = relu(x@W1 + b1) @ W2 + b2."""
    k = pl.program_id(1)

    @pl.when(k == 0)
    def _():
        acc_ref[...] = jnp.zeros_like(acc_ref)

    # fc_1 chunk: cast x f32 -> bf16 on the VPU (hidden under MXU pushes),
    # bf16 MXU matmul with f32 accumulation.
    x_bf16 = x_ref[...].astype(jnp.bfloat16)
    h = jnp.dot(x_bf16, w1_ref[...], preferred_element_type=jnp.float32)
    # Bias + ReLU in f32.  Elementwise over the d_ff chunk -> exact under
    # d_ff chunking.  Dropout: inference mode -> identity.
    h = jnp.maximum(h + b1_ref[...], 0.0)
    # fc_2 chunk: accumulate into the resident f32 accumulator.
    acc_ref[...] += jnp.dot(h.astype(jnp.bfloat16), w2_ref[...],
                            preferred_element_type=jnp.float32)

    @pl.when(k == pl.num_programs(1) - 1)
    def _():
        o_ref[...] = (acc_ref[...] + b2_ref[...]).astype(o_ref.dtype)


def prepare_ffn_params(w1, b1, w2, b2, *, align=None):
    """Pad + cast FFN weights ONCE at model-load time (hoisted off the hot path).

    w1: (d_model, d_ff), w2: (d_ff, d_model)  -- transposed vs. PyTorch
    nn.Linear.weight.  Zero padding keeps the math exact for real rows/cols.
    """
    if align is None:
        align = _MXU_ALIGN
    d_model, d_ff = w1.shape
    dmp = _round_up(d_model, align)
    dffp = _round_up(d_ff, align)
    w1p = jnp.pad(w1.astype(jnp.bfloat16),
                  ((0, dmp - d_model), (0, dffp - d_ff)))
    w2p = jnp.pad(w2.astype(jnp.bfloat16),
                  ((0, dffp - d_ff), (0, dmp - d_model)))
    b1p = jnp.pad(b1.astype(jnp.float32), (0, dffp - d_ff)).reshape(1, dffp)
    b2p = jnp.pad(b2.astype(jnp.float32), (0, dmp - d_model)).reshape(1, dmp)
    return {"w1": w1p, "b1": b1p, "w2": w2p, "b2": b2p}


@functools.partial(jax.jit, static_argnames=("tm",))
def ffn_apply(x, params, *, tm=512):
    """x: (batch, seq, d_model) f32, params from prepare_ffn_params."""
    batch, seq, d_model = x.shape
    w1p, b1p, w2p, b2p = params["w1"], params["b1"], params["w2"], params["b2"]
    dmp, dffp = w1p.shape
    M = batch * seq

    # Adaptive row tile: don't pad a decode-sized call up to a full 512-row slab.
    tm_eff = min(tm, _round_up(M, 8))
    Mp = _round_up(M, tm_eff)

    # d_ff streaming decision: keep bf16 weights fully resident (single-buffered)
    # when they fit half the VMEM budget; otherwise stream aligned d_ff chunks.
    weight_budget = _VMEM_LIMIT_BYTES // 2
    resident_bytes = 2 * dmp * dffp * 2          # W1 + W2, bf16, single buffer
    if resident_bytes <= weight_budget:
        tk = dffp
    else:
        # Largest align-multiple chunk that fits the budget when double-buffered
        # and exactly divides the padded d_ff (keeps BlockSpecs exact).
        per_col = 2 * 2 * dmp * 2                # 2 mats x 2 buffers x dmp x bf16
        max_tk = max(_MXU_ALIGN,
                     (weight_budget // per_col) // _MXU_ALIGN * _MXU_ALIGN)
        tk = _MXU_ALIGN
        for cand in range(_MXU_ALIGN, min(max_tk, dffp) + 1, _MXU_ALIGN):
            if dffp % cand == 0:
                tk = cand
    n_k = dffp // tk

    # x stays f32; the kernel casts to bf16 on the fly.
    x2d = jnp.pad(x.reshape(M, d_model), ((0, Mp - M), (0, dmp - d_model)))

    single = pl.Buffered(1)

    def weight_spec(shape, index_map):
        # Constant-index_map weights: single buffer (no point double-buffering).
        if n_k == 1:
            return pl.BlockSpec(shape, index_map, pipeline_mode=single)
        return pl.BlockSpec(shape, index_map)

    in_specs = [
        pl.BlockSpec((tm_eff, dmp), lambda i, k: (i, 0)),           # x row tile
        weight_spec((dmp, tk), lambda i, k: (0, k)),                # W1 chunk
        weight_spec((1, tk), lambda i, k: (0, k)),                  # b1 chunk
        weight_spec((tk, dmp), lambda i, k: (k, 0)),                # W2 chunk
        pl.BlockSpec((1, dmp), lambda i, k: (0, 0),
                     pipeline_mode=single),                         # b2 (resident)
    ]

    out2d = pl.pallas_call(
        _ffn_kernel,
        out_shape=jax.ShapeDtypeStruct((Mp, dmp), x.dtype),
        grid_spec=pltpu.PrefetchScalarGridSpec(
            num_scalar_prefetch=0,
            grid=(Mp // tm_eff, n_k),
            in_specs=in_specs,
            out_specs=pl.BlockSpec((tm_eff, dmp), lambda i, k: (i, 0)),
            scratch_shapes=[pltpu.VMEM((tm_eff, dmp), jnp.float32)],
        ),
        compiler_params=pltpu.CompilerParams(
            dimension_semantics=("parallel", "arbitrary"),
            vmem_limit_bytes=_VMEM_LIMIT_BYTES,
        ),
    )(x2d, w1p, b1p, w2p, b2p)

    # Trim row/lane padding and restore (batch, seq, d_model).
    return out2d[:M, :d_model].reshape(batch, seq, d_model)


def positionwise_ffn(x, w1, b1, w2, b2, *, tm=512):
    """One-shot convenience wrapper.  In a real model, call prepare_ffn_params
    once at load time and ffn_apply per step (weight prep hoisted off hot path)."""
    return ffn_apply(x, prepare_ffn_params(w1, b1, w2, b2), tm=tm)


def _ref_ffn(x, w1, b1, w2, b2):
    h = jnp.maximum(x @ w1 + b1, 0.0)
    return h @ w2 + b2


if __name__ == "__main__":
    batch, seq, d_model, d_ff = 2, 8, 32, 64

    key = jax.random.PRNGKey(0)
    kx, kw1, kb1, kw2, kb2 = jax.random.split(key, 5)

    x = jax.random.normal(kx, (batch, seq, d_model), dtype=jnp.float32)

    # Deterministic PyTorch-nn.Linear-style init (uniform in +-1/sqrt(fan_in)).
    lim1 = 1.0 / (d_model ** 0.5)
    w1 = jax.random.uniform(kw1, (d_model, d_ff), jnp.float32, -lim1, lim1)
    b1 = jax.random.uniform(kb1, (d_ff,), jnp.float32, -lim1, lim1)
    lim2 = 1.0 / (d_ff ** 0.5)
    w2 = jax.random.uniform(kw2, (d_ff, d_model), jnp.float32, -lim2, lim2)
    b2 = jax.random.uniform(kb2, (d_model,), jnp.float32, -lim2, lim2)

    # Weight pad/cast done once (model-load time), not per call.
    params = prepare_ffn_params(w1, b1, w2, b2)
    params = jax.tree_util.tree_map(jax.block_until_ready, params)

    out = ffn_apply(x, params)
    out = jax.block_until_ready(out)

    ref = _ref_ffn(x, w1, b1, w2, b2)
    assert out.shape == (batch, seq, d_model)
    # bf16 matmul operands (f32 accumulation) -> ~1e-3-level deviations expected.
    assert jnp.allclose(out, ref, atol=2e-2, rtol=2e-2), "mismatch vs reference"

    print("KERNEL_OK")
</pallas_src>

<mosaic_0001>
module attributes {stable_mosaic.version = 11 : i64} {
  func.func @_ffn_kernel(%arg0: i32, %arg1: i32, %arg2: memref<16x128xf32, #tpu.memory_space<vmem>>, %arg3: memref<128x128xbf16, #tpu.memory_space<vmem>>, %arg4: memref<1x128xf32, #tpu.memory_space<vmem>>, %arg5: memref<128x128xbf16, #tpu.memory_space<vmem>>, %arg6: memref<1x128xf32, #tpu.memory_space<vmem>>, %arg7: memref<16x128xf32, #tpu.memory_space<vmem>>, %arg8: memref<16x128xf32, #tpu.memory_space<vmem>>) attributes {dimension_semantics = [#tpu.dimension_semantics<parallel>, #tpu.dimension_semantics<arbitrary>], iteration_bounds = array<i64: 1, 1>, scalar_prefetch = 0 : i64, scratch_operands = 1 : i64, tpu.core_type = #tpu.core_type<tc>, window_params = [{transform_indices = @transform_0, window_bounds = array<i64: 16, 128>}, {pipeline_mode = #tpu.pipeline_mode<synchronous>, transform_indices = @transform_1, window_bounds = array<i64: 128, 128>}, {pipeline_mode = #tpu.pipeline_mode<synchronous>, transform_indices = @transform_2, window_bounds = array<i64: 1, 128>}, {pipeline_mode = #tpu.pipeline_mode<synchronous>, transform_indices = @transform_3, window_bounds = array<i64: 128, 128>}, {pipeline_mode = #tpu.pipeline_mode<synchronous>, transform_indices = @transform_4, window_bounds = array<i64: 1, 128>}, {transform_indices = @transform_5, window_bounds = array<i64: 16, 128>}]} {
    %c0_i32 = arith.constant 0 : i32
    %0 = arith.cmpi eq, %arg1, %c0_i32 : i32
    %1 = arith.extui %0 : i1 to i32
    %c0_i32_0 = arith.constant 0 : i32
    %2 = arith.cmpi ne, %1, %c0_i32_0 : i32
    scf.if %2 {
      %cst_16 = arith.constant 0.000000e+00 : f32
      %21 = vector.broadcast %cst_16 : f32 to vector<16x128xf32>
      %c0_17 = arith.constant 0 : index
      %c0_18 = arith.constant 0 : index
      %22 = vector.load %arg8[%c0_17, %c0_18] : memref<16x128xf32, #tpu.memory_space<vmem>>, vector<16x128xf32>
      tpu.vector_store %arg8[%c0_17, %c0_18], %21 {strides = array<i32>} : memref<16x128xf32, #tpu.memory_space<vmem>>, vector<16x128xf32>,
    } else {
    }
    %c0 = arith.constant 0 : index
    %c0_1 = arith.constant 0 : index
    %3 = vector.load %arg2[%c0, %c0_1] : memref<16x128xf32, #tpu.memory_space<vmem>>, vector<16x128xf32>
    %4 = arith.truncf %3 : vector<16x128xf32> to vector<16x128xbf16>
    %c0_2 = arith.constant 0 : index
    %c0_3 = arith.constant 0 : index
    %5 = vector.load %arg3[%c0_2, %c0_3] : memref<128x128xbf16, #tpu.memory_space<vmem>>, vector<128x128xbf16>
    %cst = arith.constant dense<0.000000e+00> : vector<16x128xf32>
    %6 = tpu.matmul %4, %5, %cst {dimension_numbers = #tpu.dot_dimension_numbers<[1], [0], [0], [1], [0, 0, 1, 1], [], []>} : vector<16x128xbf16>, vector<128x128xbf16>, vector<16x128xf32> -> vector<16x128xf32>
    %c0_4 = arith.constant 0 : index
    %c0_5 = arith.constant 0 : index
    %7 = vector.load %arg4[%c0_4, %c0_5] : memref<1x128xf32, #tpu.memory_space<vmem>>, vector<1x128xf32>
    %8 = vector.broadcast %7 : vector<1x128xf32> to vector<16x128xf32>
    %9 = arith.addf %6, %8 : vector<16x128xf32>
    %cst_6 = arith.constant 0.000000e+00 : f32
    %10 = vector.broadcast %cst_6 : f32 to vector<16x128xf32>
    %11 = arith.maximumf %9, %10 : vector<16x128xf32>
    %c0_7 = arith.constant 0 : index
    %c0_8 = arith.constant 0 : index
    %12 = vector.load %arg8[%c0_7, %c0_8] : memref<16x128xf32, #tpu.memory_space<vmem>>, vector<16x128xf32>
    %13 = arith.truncf %11 : vector<16x128xf32> to vector<16x128xbf16>
    %c0_9 = arith.constant 0 : index
    %c0_10 = arith.constant 0 : index
    %14 = vector.load %arg5[%c0_9, %c0_10] : memref<128x128xbf16, #tpu.memory_space<vmem>>, vector<128x128xbf16>
    %cst_11 = arith.constant dense<0.000000e+00> : vector<16x128xf32>
    %15 = tpu.matmul %13, %14, %cst_11 {dimension_numbers = #tpu.dot_dimension_numbers<[1], [0], [0], [1], [0, 0, 1, 1], [], []>} : vector<16x128xbf16>, vector<128x128xbf16>, vector<16x128xf32> -> vector<16x128xf32>
    %16 = arith.addf %12, %15 : vector<16x128xf32>
    %c0_12 = arith.constant 0 : index
    %c0_13 = arith.constant 0 : index
    %17 = vector.load %arg8[%c0_12, %c0_13] : memref<16x128xf32, #tpu.memory_space<vmem>>, vector<16x128xf32>
    tpu.vector_store %arg8[%c0_12, %c0_13], %16 {strides = array<i32>} : memref<16x128xf32, #tpu.memory_space<vmem>>, vector<16x128xf32>,
    %c0_i32_14 = arith.constant 0 : i32
    %18 = arith.cmpi eq, %arg1, %c0_i32_14 : i32
    %19 = arith.extui %18 : i1 to i32
    %c0_i32_15 = arith.constant 0 : i32
    %20 = arith.cmpi ne, %19, %c0_i32_15 : i32
    scf.if %20 {
      %c0_16 = arith.constant 0 : index
      %c0_17 = arith.constant 0 : index
      %21 = vector.load %arg8[%c0_16, %c0_17] : memref<16x128xf32, #tpu.memory_space<vmem>>, vector<16x128xf32>
      %c0_18 = arith.constant 0 : index
      %c0_19 = arith.constant 0 : index
      %22 = vector.load %arg6[%c0_18, %c0_19] : memref<1x128xf32, #tpu.memory_space<vmem>>, vector<1x128xf32>
      %23 = vector.broadcast %22 : vector<1x128xf32> to vector<16x128xf32>
      %24 = arith.addf %21, %23 : vector<16x128xf32>
      %c0_20 = arith.constant 0 : index
      %c0_21 = arith.constant 0 : index
      %25 = vector.load %arg7[%c0_20, %c0_21] : memref<16x128xf32, #tpu.memory_space<vmem>>, vector<16x128xf32>
      tpu.vector_store %arg7[%c0_20, %c0_21], %24 {strides = array<i32>} : memref<16x128xf32, #tpu.memory_space<vmem>>, vector<16x128xf32>,
    } else {
    }
    return
  }
  func.func @transform_0(%arg0: i32, %arg1: i32) -> (i32, i32) {
    %c0_i32 = arith.constant 0 : i32
    %c0_i32_0 = arith.constant 0 : i32
    return %arg0, %c0_i32 : i32, i32
  }
  func.func @transform_1(%arg0: i32, %arg1: i32) -> (i32, i32) {
    %c0_i32 = arith.constant 0 : i32
    %c0_i32_0 = arith.constant 0 : i32
    return %c0_i32, %arg1 : i32, i32
  }
  func.func @transform_2(%arg0: i32, %arg1: i32) -> (i32, i32) {
    %c0_i32 = arith.constant 0 : i32
    %c0_i32_0 = arith.constant 0 : i32
    return %c0_i32, %arg1 : i32, i32
  }
  func.func @transform_3(%arg0: i32, %arg1: i32) -> (i32, i32) {
    %c0_i32 = arith.constant 0 : i32
    %c0_i32_0 = arith.constant 0 : i32
    return %arg1, %c0_i32 : i32, i32
  }
  func.func @transform_4(%arg0: i32, %arg1: i32) -> (i32, i32) {
    %c0_i32 = arith.constant 0 : i32
    %c0_i32_0 = arith.constant 0 : i32
    %c0_i32_1 = arith.constant 0 : i32
    return %c0_i32, %c0_i32_0 : i32, i32
  }
  func.func @transform_5(%arg0: i32, %arg1: i32) -> (i32, i32) {
    %c0_i32 = arith.constant 0 : i32
    %c0_i32_0 = arith.constant 0 : i32
    return %arg0, %c0_i32 : i32, i32
  }
}

</mosaic_0001>

<bundles_post_ra>
// kernel: ffn_apply.1
= control target key start
LH: loop header
LB: loop body
LE: loop exit
PB: predicated region body
PF: predicated region fallthrough
CT: control target
= control target key end

     0   :  { %10 = vsyncpa [#allocation4], 0  ;;  %s508_s0 = inlined_call_operand.vmem [shape: f32[16,128], index: 0, kind: input, shape index: {}]   ;;  %s509_s1 = inlined_call_operand.hbm [shape: bf16[128,128], index: 1, kind: input, shape index: {}]   ;;  %s510_s2 = inlined_call_operand.vmem [shape: f32[1,128], index: 2, kind: input, shape index: {}]   ;;  %s511_s3 = inlined_call_operand.hbm [shape: bf16[128,128], index: 3, kind: input, shape index: {}]   ;;  %s512_s4 = inlined_call_operand.vmem [shape: f32[1,128], index: 4, kind: input, shape index: {}]   ;;  %s513_s5 = inlined_call_operand.vmem [shape: f32[16,128], index: 5, kind: output, shape index: {}]  }
   0x1   :  { %11 = vsyncpa [#allocation6], 0  ;;  %s448_s18 = smov [#allocation3]  }
   0x2   :  { %s19_s19 = sshll.u32 %s448_s18, 4  ;;  %s20_s19 = int_to_ptr.vmem [resolvable:$true] %s19_s19 }
   0x3   :  { %s412_s20 = scalar_lea.vmem %s20_s19, 1024  ;;  %p417_p1 = scmp.lt.s32.totalorder %s20_s19, %s20_s19 }
   0x4   :  { %p413_p0 = scmp.ne.s32.totalorder %s20_s19, %s412_s20  ;;  %p418_p2 = scmp.lt.s32.totalorder %s412_s20, %s412_s20 }
   0x6   :  { %p419_p3 = por %p418_p2, %p417_p1 }
   0x8   :  { %p420_p4 = pnand %p419_p3, %p413_p0 }
   0xa   :  { %423 = shalt.err (!%p420_p4)
}
   0xb   :  { %s449_s21 = smov 64   ;;  %s450_s22 = smov 4  }
   0xc   :  { %25 = dma.hbm_to_vmem [thread:$0]  %s509_s1, 1024, %s20_s19, [#allocation4], %s449_s21, %s449_s21, %s450_s22  }
   0xd   :  { %s451_s25 = smov [#allocation5]  }
   0xe   :  { %s33_s26 = sshll.u32 %s451_s25, 4  ;;  %s34_s26 = int_to_ptr.vmem [resolvable:$true] %s33_s26 }
   0xf   :  { %s432_s27 = scalar_lea.vmem %s34_s26, 1024  ;;  %p437_p6 = scmp.lt.s32.totalorder %s34_s26, %s34_s26 }
  0x10   :  { %p433_p5 = scmp.ne.s32.totalorder %s34_s26, %s432_s27  ;;  %p438_p7 = scmp.lt.s32.totalorder %s432_s27, %s432_s27 }
  0x12   :  { %p439_p8 = por %p438_p7, %p437_p6 }
  0x14   :  { %p440_p9 = pnand %p439_p8, %p433_p5 }
  0x16   :  { %443 = shalt.err (!%p440_p9)
}
  0x17   :  { %39 = dma.hbm_to_vmem [thread:$0]  %s511_s3, 1024, %s34_s26, [#allocation6], %s449_s21, %s449_s21, %s450_s22  }
  0x18   :  { %444 = dma.done.wait [#allocation4], 1024  }
  0x19   :  { %445 = vsyncadd [#allocation4], 4294966272 }
  0x1a   :  { %446 = dma.done.wait [#allocation6], 1024  }
  0x1b   :  { %447 = vsyncadd [#allocation6], 4294966272  ;;  %v452_v0 = vmov 0.0   ;;  %vm453_vm0 = vmmov 0   ;;  %v388_v1 = vld [vmem:[#allocation3 + $0x38] sm:$0xff]   ;;  %v389_v2 = vld [vmem:[#allocation3 + $0x30] sm:$0xff]  }
  0x1c   :  { %342 = vmatprep.subr.bf16.mxu0 %v452_v0  ;;  %358 = vmatprep.mubr.msk.bf16.mxu0 %vm453_vm0, %v452_v0  ;;  %v390_v3 = vld [vmem:[#allocation3 + $0x28] sm:$0xff]   ;;  %v396_v4 = vld [vmem:[#allocation5 + $0x38] sm:$0xff]   ;;  %v391_v5 = vld [vmem:[#allocation3 + $0x20] sm:$0xff]  }
  0x1d   :  { %362 = vmatprep.subr.bf16.mxu1 %v452_v0  ;;  %378 = vmatprep.mubr.msk.bf16.mxu1 %vm453_vm0, %v452_v0  ;;  %v397_v6 = vld [vmem:[#allocation5 + $0x30] sm:$0xff]   ;;  %v392_v7 = vld [vmem:[#allocation3 + $0x18] sm:$0xff]   ;;  %v398_v8 = vld [vmem:[#allocation5 + $0x28] sm:$0xff]  }
  0x1e   :  { %343 = vmatpush3.bf16.msra.mxu0 %v388_v1  ;;  %363 = vmatpush3.bf16.msra.mxu1 %v396_v4  ;;  %v393_v9 = vld [vmem:[#allocation3 + $0x10] sm:$0xff]   ;;  %v399_v10 = vld [vmem:[#allocation5 + $0x20] sm:$0xff]   ;;  %v394_v11 = vld [vmem:[#allocation3 + $0x8] sm:$0xff]  }
  0x1f   :  { %344 = vmatprep.subr.bf16.mxu0 %v452_v0  ;;  %364 = vmatprep.subr.bf16.mxu1 %v452_v0  ;;  %v400_v12 = vld [vmem:[#allocation5 + $0x18] sm:$0xff]   ;;  %v395_v13 = vld [vmem:[#allocation3] sm:$0xff]   ;;  %v56_v15 = vld [vmem:[%s508_s0 + $0x8] sm:$0xff] }
  0x20   :  { %v55_v14 = vld [vmem:[%s508_s0] sm:$0xff]  ;;  %v401_v17 = vld [vmem:[#allocation5 + $0x10] sm:$0xff]   ;;  %v402_v18 = vld [vmem:[#allocation5 + $0x8] sm:$0xff]  }
  0x21   :  { %v57_v16 = vpack.c.bf16 %v56_v15, %v55_v14  ;;  %v403_v19 = vld [vmem:[#allocation5] sm:$0xff]  }
  0x22   :  { %345 = vmatpush3.bf16.msra.mxu0 %v389_v2  ;;  %365 = vmatpush3.bf16.msra.mxu1 %v397_v6  ;;  %v306_v20 = vld [vmem:[%s510_s2] ss:$0 sm:$0xff] }
  0x23   :  { %346 = vmatprep.subr.bf16.mxu0 %v452_v0  ;;  %366 = vmatprep.subr.bf16.mxu1 %v452_v0  ;;  %v323_v30 = vld [vmem:[%s512_s4] ss:$0 sm:$0xff] }
  0x26   :  { %347 = vmatpush3.bf16.msra.mxu0 %v390_v3  ;;  %367 = vmatpush3.bf16.msra.mxu1 %v398_v8 }
  0x27   :  { %348 = vmatprep.subr.bf16.mxu0 %v452_v0  ;;  %368 = vmatprep.subr.bf16.mxu1 %v452_v0 }
  0x2a   :  { %349 = vmatpush3.bf16.msra.mxu0 %v391_v5  ;;  %369 = vmatpush3.bf16.msra.mxu1 %v399_v10 }
  0x2b   :  { %350 = vmatprep.subr.bf16.mxu0 %v452_v0  ;;  %370 = vmatprep.subr.bf16.mxu1 %v452_v0 }
  0x2e   :  { %351 = vmatpush3.bf16.msra.mxu0 %v392_v7  ;;  %371 = vmatpush3.bf16.msra.mxu1 %v400_v12 }
  0x2f   :  { %352 = vmatprep.subr.bf16.mxu0 %v452_v0  ;;  %372 = vmatprep.subr.bf16.mxu1 %v452_v0 }
  0x32   :  { %353 = vmatpush3.bf16.msra.mxu0 %v393_v9  ;;  %373 = vmatpush3.bf16.msra.mxu1 %v401_v17 }
  0x33   :  { %354 = vmatprep.subr.bf16.mxu0 %v452_v0  ;;  %374 = vmatprep.subr.bf16.mxu1 %v452_v0 }
  0x36   :  { %355 = vmatpush3.bf16.msra.mxu0 %v394_v11  ;;  %375 = vmatpush3.bf16.msra.mxu1 %v402_v18 }
  0x37   :  { %356 = vmatprep.subr.bf16.mxu0 %v452_v0  ;;  %376 = vmatprep.subr.bf16.mxu1 %v452_v0 }
  0x3a   :  { %357 = vmatpush3.bf16.msra.mxu0 %v395_v13  ;;  %377 = vmatpush3.bf16.msra.mxu1 %v403_v19 }
  0x3d   :  { %359 = vmatmul.mubr.bf16.vlgmr.msra.gmra.mxu0 %v57_v16 }
  0xfd   :  { %v163_v21 = vpop.f32.mrf.mxu0 }
  0xfe   :  { %v164_v23 = vadd.f32 %v306_v20, %v163_v21 }
  0xff   :  { %v360_v22 = vpop.f32.mrf.mxu0 }
 0x100   :  { %v170_v27 = vmax.f32 %v164_v23, 0.0 }
 0x101   :  { %v166_v24 = vpop.f32.mrf.mxu0 }
 0x102   :  { %v167_v25 = vadd.f32 %v306_v20, %v166_v24 }
 0x103   :  { %v361_v26 = vpop.f32.mrf.mxu0 }
 0x104   :  { %v171_v28 = vmax.f32 %v167_v25, 0.0 }
 0x106   :  { %v174_v29 = vpack.c.bf16 %v171_v28, %v170_v27 }
 0x108   :  { %379 = vmatmul.mubr.bf16.vlgmr.msra.gmra.mxu1 %v174_v29 }
 0x1c8   :  { %v273_v31 = vpop.f32.mrf.mxu1 }
 0x1c9   :  { %v296_v32 = vadd.f32 %v323_v30, %v273_v31 }
 0x1ca   :  { %v380_v33 = vpop.f32.mrf.mxu1 }
 0x1cb   :  { %298 = vst [vmem:[%s513_s5] sm:$0xff] %v296_v32 }
 0x1cc   :  { %v276_v34 = vpop.f32.mrf.mxu1 }
 0x1cd   :  { %v297_v35 = vadd.f32 %v323_v30, %v276_v34 }
 0x1ce   :  { %v381_v36 = vpop.f32.mrf.mxu1 }
 0x1cf   :  { %299 = vst [vmem:[%s513_s5 + $0x8] sm:$0xff] %v297_v35 }
 0x1d0   :  { %304 = vsyncpa [#allocation4], 1 }
 0x1d1   :  { %305 = vsyncpa [#allocation6], 1 }

</bundles_post_ra>
